<compile_context>
chip_gen: v6e
topology: v6e:2x2x1
jax: 0.10.0
libtpu: 0.0.40
codegen_flags: <defaults>
</compile_context>

<pallas_src>
import functools

import jax
import jax.numpy as jnp
from jax import lax
from jax.experimental import pallas as pl
from jax.experimental.pallas import tpu as pltpu

BN_EPS = 1e-5
F32 = jnp.float32
LANE = 128

# bf16 operands feed the MXU on real TPUs; the XLA:CPU executor used by the
# Pallas interpreter does not implement BF16 x BF16 = F32 dots, so fall back to
# f32 matmul operands when the default backend is not a TPU.
MM = jnp.bfloat16 if jax.default_backend() == "tpu" else jnp.float32


def _ceil_to(x, m):
    return ((x + m - 1) // m) * m


def _pad2(a, rows, cols):
    out = jnp.zeros((rows, cols), a.dtype)
    return out.at[: a.shape[0], : a.shape[1]].set(a)


# --------------------------- fused Pallas kernel ---------------------------
# grid = (num_layer,), sequential ("arbitrary").  Per-layer weights are blocked
# on the layer axis; structural inputs use constant index maps (fetched once);
# node state h and the virtual-node state are VMEM scratch carried across the
# layer axis.  All matmuls accumulate in f32.

def _gnn_all_layers_kernel(
    # scalar prefetch (SMEM)
    src_ref, dst_ref,
    # inputs
    h0_ref, pb_ref, psum_ref, vn0_ref,
    e_ref, w1_ref, b1_ref, w2_ref, b2_ref,
    vw1_ref, vb1_ref, vw2_ref, vb2_ref,
    ope_ref, invc_ref, pw_ref, pbias_ref,
    # output
    out_ref,
    # scratch
    h_state, vn_state, agg,
):
    layer = pl.program_id(0)
    n_layers = pl.num_programs(0)
    n_edges = src_ref.shape[0]

    @pl.when(layer == 0)
    def _init():
        h_state[...] = h0_ref[...]
        vn_state[...] = vn0_ref[...]

    # 1) virtual node -> graph nodes:  h_in = h + Pb @ vn
    h_in = h_state[...] + jnp.dot(
        pb_ref[...], vn_state[...].astype(MM), preferred_element_type=F32)
    h_state[...] = h_in          # h_state holds h_in for the rest of this layer

    # 2) GIN message + scatter-add (sparse; edge ids come from SMEM):
    #      msg_e = relu(h_in[src_e] + bond_emb_e);   agg[dst_e] += msg_e
    agg[...] = jnp.zeros_like(agg)

    def edge_body(i, carry):
        s = src_ref[i]
        d = dst_ref[i]
        msg = jnp.maximum(h_state[pl.ds(s, 1), :] + e_ref[pl.ds(i, 1), :], 0.0)
        agg[pl.ds(d, 1), :] = agg[pl.ds(d, 1), :] + msg
        return carry

    lax.fori_loop(0, n_edges, edge_body, 0)

    # 3) GIN MLP (BatchNorms folded into w/b on the host):
    #      h_out = Lin2'(relu(Lin1'((1+eps)*h_in + agg)))
    pre = ope_ref[...] * h_in + agg[...]
    t = jnp.maximum(
        jnp.dot(pre.astype(MM), w1_ref[...], preferred_element_type=F32)
        + b1_ref[...], 0.0)
    h_out = (jnp.dot(t.astype(MM), w2_ref[...], preferred_element_type=F32)
             + b2_ref[...])

    is_last = layer == n_layers - 1

    @pl.when(jnp.logical_not(is_last))
    def _update():
        # virtual-node update: vn = MLP(global_add_pool(h_in, batch) + vn)
        pooled = jnp.dot(psum_ref[...], h_state[...].astype(MM),
                         preferred_element_type=F32) + vn_state[...]
        tv = jnp.maximum(
            jnp.dot(pooled.astype(MM), vw1_ref[...],
                    preferred_element_type=F32) + vb1_ref[...], 0.0)
        vn_state[...] = jnp.maximum(
            jnp.dot(tv.astype(MM), vw2_ref[...],
                    preferred_element_type=F32) + vb2_ref[...], 0.0)
        h_state[...] = jnp.maximum(h_out, 0.0)    # ReLU on non-last layers

    @pl.when(is_last)
    def _finalize():
        # JK='last' (no ReLU) -> mean pooling (precomputed inv_counts) -> head
        g_sum = jnp.dot(psum_ref[...], h_out.astype(MM),
                        preferred_element_type=F32)
        g_mean = g_sum * invc_ref[...]
        out_ref[...] = (jnp.dot(g_mean.astype(MM), pw_ref[...],
                                preferred_element_type=F32) + pbias_ref[...])


def _const_spec(shape):
    zeros = (0,) * len(shape)
    return pl.BlockSpec(shape, lambda l, *_: zeros)


def _layer_spec(shape):
    zeros = (0,) * len(shape)
    return pl.BlockSpec((None,) + tuple(shape), lambda l, *_: (l,) + zeros)


# ------------------------ parameter construction ------------------------

def _bn_params(dim):
    return dict(gamma=jnp.ones((1, dim), F32), beta=jnp.zeros((1, dim), F32),
                mean=jnp.zeros((1, dim), F32), var=jnp.ones((1, dim), F32))


def init_params(key, *, emb_dim, num_layer, num_class,
                n_atom_feat, atom_vocab, n_bond_feat, bond_vocab):
    keys = iter(jax.random.split(key, 128))

    def lin(fan_in, shape):
        return (jax.random.normal(next(keys), shape, F32)
                / jnp.sqrt(jnp.float32(fan_in)))

    params = {}
    params['atom_emb'] = [jax.random.normal(next(keys), (atom_vocab, emb_dim),
                                            F32) * 0.1
                          for _ in range(n_atom_feat)]
    params['vn_emb'] = jnp.zeros((1, emb_dim), F32)   # OGB init: zeros

    params['layers'] = []
    for _ in range(num_layer):
        params['layers'].append(dict(
            bond_emb=[jax.random.normal(next(keys), (bond_vocab, emb_dim),
                                        F32) * 0.1 for _ in range(n_bond_feat)],
            eps=jnp.zeros((1, 1), F32),
            w1=lin(emb_dim, (emb_dim, 2 * emb_dim)),
            b1=jnp.zeros((1, 2 * emb_dim), F32),
            bn1=_bn_params(2 * emb_dim),
            w2=lin(2 * emb_dim, (2 * emb_dim, emb_dim)),
            b2=jnp.zeros((1, emb_dim), F32),
            bn_out=_bn_params(emb_dim)))

    params['vn_mlps'] = []
    for _ in range(num_layer - 1):
        params['vn_mlps'].append(dict(
            w1=lin(emb_dim, (emb_dim, 2 * emb_dim)),
            b1=jnp.zeros((1, 2 * emb_dim), F32),
            bn1=_bn_params(2 * emb_dim),
            w2=lin(2 * emb_dim, (2 * emb_dim, emb_dim)),
            b2=jnp.zeros((1, emb_dim), F32),
            bn2=_bn_params(emb_dim)))

    params['pred_w'] = lin(emb_dim, (emb_dim, num_class))
    params['pred_b'] = jnp.zeros((1, num_class), F32)
    return params


def prepare_inference_params(params):
    """Fold eval-mode BatchNorms into the Linears, pad lane dims to multiples of
    128, stack per-layer tensors on a leading layer axis and pre-cast matmul
    operands to the MXU dtype.  Called ONCE, outside the jitted forward."""
    layers = params['layers']
    L = len(layers)
    D = params['vn_emb'].shape[1]
    H = layers[0]['w1'].shape[1]
    C = params['pred_w'].shape[1]
    Dp, Hp, Cp = _ceil_to(D, LANE), _ceil_to(H, LANE), _ceil_to(C, LANE)

    def fold(w, b, bn):
        s = bn['gamma'] * lax.rsqrt(bn['var'] + BN_EPS)
        return w * s, (b - bn['mean']) * s + bn['beta']

    w1s, b1s, w2s, b2s = [], [], [], []
    vw1s, vb1s, vw2s, vb2s = [], [], [], []
    opes, bond_tables = [], []
    for l, lp in enumerate(layers):
        w1, b1 = fold(lp['w1'], lp['b1'], lp['bn1'])
        w2, b2 = fold(lp['w2'], lp['b2'], lp['bn_out'])
        w1s.append(_pad2(w1, Dp, Hp).astype(MM)); b1s.append(_pad2(b1, 1, Hp))
        w2s.append(_pad2(w2, Hp, Dp).astype(MM)); b2s.append(_pad2(b2, 1, Dp))
        opes.append((1.0 + lp['eps']).reshape(1, 1))
        bond_tables.append([_pad2(t, t.shape[0], Dp) for t in lp['bond_emb']])
        if l < L - 1:
            vp = params['vn_mlps'][l]
            vw1, vb1 = fold(vp['w1'], vp['b1'], vp['bn1'])
            vw2, vb2 = fold(vp['w2'], vp['b2'], vp['bn2'])
        else:  # last layer has no vn update; pad stack with zeros (pl.when gated)
            vw1 = jnp.zeros((D, H), F32); vb1 = jnp.zeros((1, H), F32)
            vw2 = jnp.zeros((H, D), F32); vb2 = jnp.zeros((1, D), F32)
        vw1s.append(_pad2(vw1, Dp, Hp).astype(MM)); vb1s.append(_pad2(vb1, 1, Hp))
        vw2s.append(_pad2(vw2, Hp, Dp).astype(MM)); vb2s.append(_pad2(vb2, 1, Dp))

    return dict(
        atom_emb=[_pad2(t, t.shape[0], Dp) for t in params['atom_emb']],
        bond_emb=bond_tables,
        vn_emb=_pad2(params['vn_emb'], 1, Dp),
        w1=jnp.stack(w1s), b1=jnp.stack(b1s),
        w2=jnp.stack(w2s), b2=jnp.stack(b2s),
        vw1=jnp.stack(vw1s), vb1=jnp.stack(vb1s),
        vw2=jnp.stack(vw2s), vb2=jnp.stack(vb2s),
        one_plus_eps=jnp.stack(opes),                       # [L, 1, 1]
        pred_w=_pad2(params['pred_w'], Dp, Cp).astype(MM),
        pred_b=_pad2(params['pred_b'], 1, Cp))


# ------------------------------ forward ------------------------------

@functools.partial(jax.jit, static_argnames=('num_graphs', 'num_class'))
def gnn_forward(prep, node_feat, edge_index, edge_attr, batch, *,
                num_graphs, num_class):
    N = node_feat.shape[0]
    E = edge_index.shape[1]
    B = num_graphs
    L, Dp, Hp = prep['w1'].shape
    Cp = prep['pred_w'].shape[1]

    # ---- glue (data-dependent lookups; cheap, stays in XLA) ----
    h0 = sum(prep['atom_emb'][f][node_feat[:, f]]
             for f in range(node_feat.shape[1]))                    # [N, Dp] f32
    e_stack = jnp.stack([
        sum(prep['bond_emb'][l][f][edge_attr[:, f]]
            for f in range(edge_attr.shape[1])) for l in range(L)]) # [L, E, Dp]
    pb_f = jax.nn.one_hot(batch, B, dtype=F32)                      # [N, B]
    inv_counts = (1.0 / jnp.maximum(pb_f.sum(axis=0), 1.0))[:, None]  # [B, 1]
    pb = pb_f.astype(MM)
    # Psum kept as an explicit second orientation (computed once, resident
    # across all layers) to avoid transposed-LHS matmuls inside the kernel.
    psum = pb.T                                                     # [B, N]
    vn0 = jnp.tile(prep['vn_emb'], (B, 1))                          # [B, Dp] f32
    src_ids = edge_index[0].astype(jnp.int32)
    dst_ids = edge_index[1].astype(jnp.int32)

    grid_spec = pltpu.PrefetchScalarGridSpec(
        num_scalar_prefetch=2,
        grid=(L,),
        in_specs=[
            _const_spec((N, Dp)),                       # h0
            _const_spec((N, B)),                        # Pb   (vn broadcast)
            _const_spec((B, N)),                        # Psum (pooling)
            _const_spec((B, Dp)),                       # vn0
            _layer_spec((E, Dp)),                       # bond embeddings
            _layer_spec((Dp, Hp)), _layer_spec((1, Hp)),  # GIN w1, b1
            _layer_spec((Hp, Dp)), _layer_spec((1, Dp)),  # GIN w2, b2
            _layer_spec((Dp, Hp)), _layer_spec((1, Hp)),  # vn  w1, b1
            _layer_spec((Hp, Dp)), _layer_spec((1, Dp)),  # vn  w2, b2
            _layer_spec((1, 1)),                        # 1 + eps
            _const_spec((B, 1)),                        # inv node counts
            _const_spec((Dp, Cp)),                      # head weight
            _const_spec((1, Cp)),                       # head bias
        ],
        out_specs=pl.BlockSpec((B, Cp), lambda l, *_: (0, 0)),
        scratch_shapes=[
            pltpu.VMEM((N, Dp), F32),   # h / h_in carry
            pltpu.VMEM((B, Dp), F32),   # virtual-node carry
            pltpu.VMEM((N, Dp), F32),   # scatter-add accumulator
        ])

    out_pad = pl.pallas_call(
        _gnn_all_layers_kernel,
        grid_spec=grid_spec,
        out_shape=jax.ShapeDtypeStruct((B, Cp), F32),
        compiler_params=pltpu.CompilerParams(
            dimension_semantics=("arbitrary",),
            vmem_limit_bytes=32 * 1024 * 1024),
    )(src_ids, dst_ids, h0, pb, psum, vn0, e_stack,
      prep['w1'], prep['b1'], prep['w2'], prep['b2'],
      prep['vw1'], prep['vb1'], prep['vw2'], prep['vb2'],
      prep['one_plus_eps'], inv_counts, prep['pred_w'], prep['pred_b'])

    return out_pad[:, :num_class]


# ------------------------- pure-JAX f32 reference -------------------------

def reference_forward(params, node_feat, edge_index, edge_attr, batch, num_graphs):
    D = params['vn_emb'].shape[1]
    N = node_feat.shape[0]
    B = num_graphs
    L = len(params['layers'])

    def bn(x, p):
        return (x - p['mean']) * lax.rsqrt(p['var'] + BN_EPS) * p['gamma'] + p['beta']

    h = sum(params['atom_emb'][f][node_feat[:, f]]
            for f in range(node_feat.shape[1]))
    vn = jnp.tile(params['vn_emb'], (B, 1))
    src, dst = edge_index[0], edge_index[1]
    for l in range(L):
        lp = params['layers'][l]
        h_in = h + vn[batch]
        e = sum(lp['bond_emb'][f][edge_attr[:, f]]
                for f in range(edge_attr.shape[1]))
        msg = jnp.maximum(h_in[src] + e, 0.0)
        agg = jnp.zeros((N, D), F32).at[dst].add(msg)
        pre = (1.0 + lp['eps']) * h_in + agg
        t = jnp.maximum(bn(pre @ lp['w1'] + lp['b1'], lp['bn1']), 0.0)
        hc = bn(t @ lp['w2'] + lp['b2'], lp['bn_out'])
        if l < L - 1:
            h = jnp.maximum(hc, 0.0)
            vp = params['vn_mlps'][l]
            pooled = jax.ops.segment_sum(h_in, batch, num_segments=B) + vn
            tv = jnp.maximum(bn(pooled @ vp['w1'] + vp['b1'], vp['bn1']), 0.0)
            vn = jnp.maximum(bn(tv @ vp['w2'] + vp['b2'], vp['bn2']), 0.0)
        else:
            h = hc
    counts = jnp.maximum(
        jax.ops.segment_sum(jnp.ones((N,), F32), batch, num_segments=B), 1.0)
    g = jax.ops.segment_sum(h, batch, num_segments=B) / counts[:, None]
    return g @ params['pred_w'] + params['pred_b']


# ------------------------------- main -------------------------------

if __name__ == "__main__":
    EMB_DIM = 32
    NUM_LAYER = 5
    NUM_CLASS = 4
    NUM_GRAPHS = 2
    NODES_PER_GRAPH = 8
    N = NUM_GRAPHS * NODES_PER_GRAPH
    N_ATOM_FEAT, ATOM_VOCAB = 2, 5
    N_BOND_FEAT, BOND_VOCAB = 2, 3

    key = jax.random.PRNGKey(0)
    k_param, k_node, k_edge = jax.random.split(key, 3)

    params = init_params(k_param, emb_dim=EMB_DIM, num_layer=NUM_LAYER,
                         num_class=NUM_CLASS,
                         n_atom_feat=N_ATOM_FEAT, atom_vocab=ATOM_VOCAB,
                         n_bond_feat=N_BOND_FEAT, bond_vocab=BOND_VOCAB)
    prep = prepare_inference_params(params)   # BN folding / padding / casting, once

    # deterministic graph structure: one ring per graph, both edge directions
    src, dst = [], []
    for g in range(NUM_GRAPHS):
        base = g * NODES_PER_GRAPH
        for i in range(NODES_PER_GRAPH):
            u, v = base + i, base + (i + 1) % NODES_PER_GRAPH
            src += [u, v]
            dst += [v, u]
    edge_index = jnp.array([src, dst], dtype=jnp.int32)
    E = edge_index.shape[1]

    node_feat = jax.random.randint(k_node, (N, N_ATOM_FEAT), 0, ATOM_VOCAB,
                                   dtype=jnp.int32)
    edge_attr = jax.random.randint(k_edge, (E, N_BOND_FEAT), 0, BOND_VOCAB,
                                   dtype=jnp.int32)
    batch = jnp.repeat(jnp.arange(NUM_GRAPHS, dtype=jnp.int32), NODES_PER_GRAPH)

    out = gnn_forward(prep, node_feat, edge_index, edge_attr, batch,
                      num_graphs=NUM_GRAPHS, num_class=NUM_CLASS)
    out = jax.block_until_ready(out)

    ref = reference_forward(params, node_feat, edge_index, edge_attr, batch,
                            NUM_GRAPHS)
    err = float(jnp.max(jnp.abs(out - ref)))
    assert out.shape == (NUM_GRAPHS, NUM_CLASS)
    assert bool(jnp.all(jnp.isfinite(out)))
    # loose tolerance covers 5 layers of bf16 MXU rounding on real TPUs
    assert jnp.allclose(out, ref, rtol=1e-1, atol=1e-1), f"max abs err {err}"
    print("KERNEL_OK")
</pallas_src>

<mosaic_0001>
module attributes {stable_mosaic.version = 11 : i64} {
  func.func @_gnn_all_layers_kernel(%arg0: i32, %arg1: memref<32xi32, #tpu.memory_space<smem>>, %arg2: memref<32xi32, #tpu.memory_space<smem>>, %arg3: memref<16x128xf32, #tpu.memory_space<vmem>>, %arg4: memref<16x2xf32, #tpu.memory_space<vmem>>, %arg5: memref<2x16xf32, #tpu.memory_space<vmem>>, %arg6: memref<2x128xf32, #tpu.memory_space<vmem>>, %arg7: memref<1x32x128xf32, #tpu.memory_space<vmem>>, %arg8: memref<1x128x128xf32, #tpu.memory_space<vmem>>, %arg9: memref<1x1x128xf32, #tpu.memory_space<vmem>>, %arg10: memref<1x128x128xf32, #tpu.memory_space<vmem>>, %arg11: memref<1x1x128xf32, #tpu.memory_space<vmem>>, %arg12: memref<1x128x128xf32, #tpu.memory_space<vmem>>, %arg13: memref<1x1x128xf32, #tpu.memory_space<vmem>>, %arg14: memref<1x128x128xf32, #tpu.memory_space<vmem>>, %arg15: memref<1x1x128xf32, #tpu.memory_space<vmem>>, %arg16: memref<1x1x1xf32, #tpu.memory_space<vmem>>, %arg17: memref<2x1xf32, #tpu.memory_space<vmem>>, %arg18: memref<128x128xf32, #tpu.memory_space<vmem>>, %arg19: memref<1x128xf32, #tpu.memory_space<vmem>>, %arg20: memref<2x128xf32, #tpu.memory_space<vmem>>, %arg21: memref<16x128xf32, #tpu.memory_space<vmem>>, %arg22: memref<2x128xf32, #tpu.memory_space<vmem>>, %arg23: memref<16x128xf32, #tpu.memory_space<vmem>>) attributes {dimension_semantics = [#tpu.dimension_semantics<arbitrary>], iteration_bounds = array<i64: 5>, scalar_prefetch = 2 : i64, scratch_operands = 3 : i64, tpu.core_type = #tpu.core_type<tc>, window_params = [{pipeline_mode = #tpu.pipeline_mode<synchronous>, transform_indices = @transform_0, window_bounds = array<i64: 16, 128>}, {pipeline_mode = #tpu.pipeline_mode<synchronous>, transform_indices = @transform_1, window_bounds = array<i64: 16, 2>}, {pipeline_mode = #tpu.pipeline_mode<synchronous>, transform_indices = @transform_2, window_bounds = array<i64: 2, 16>}, {pipeline_mode = #tpu.pipeline_mode<synchronous>, transform_indices = @transform_3, window_bounds = array<i64: 2, 128>}, {transform_indices = @transform_4, window_bounds = array<i64: 1, 32, 128>}, {transform_indices = @transform_5, window_bounds = array<i64: 1, 128, 128>}, {transform_indices = @transform_6, window_bounds = array<i64: 1, 1, 128>}, {transform_indices = @transform_7, window_bounds = array<i64: 1, 128, 128>}, {transform_indices = @transform_8, window_bounds = array<i64: 1, 1, 128>}, {transform_indices = @transform_9, window_bounds = array<i64: 1, 128, 128>}, {transform_indices = @transform_10, window_bounds = array<i64: 1, 1, 128>}, {transform_indices = @transform_11, window_bounds = array<i64: 1, 128, 128>}, {transform_indices = @transform_12, window_bounds = array<i64: 1, 1, 128>}, {transform_indices = @transform_13, window_bounds = array<i64: 1, 1, 1>}, {pipeline_mode = #tpu.pipeline_mode<synchronous>, transform_indices = @transform_14, window_bounds = array<i64: 2, 1>}, {pipeline_mode = #tpu.pipeline_mode<synchronous>, transform_indices = @transform_15, window_bounds = array<i64: 128, 128>}, {pipeline_mode = #tpu.pipeline_mode<synchronous>, transform_indices = @transform_16, window_bounds = array<i64: 1, 128>}, {pipeline_mode = #tpu.pipeline_mode<synchronous>, transform_indices = @transform_17, window_bounds = array<i64: 2, 128>}]} {
    %c0_i32 = arith.constant 0 : i32
    %0 = arith.cmpi eq, %arg0, %c0_i32 : i32
    %1 = arith.extui %0 : i1 to i32
    %c0_i32_0 = arith.constant 0 : i32
    %2 = arith.cmpi ne, %1, %c0_i32_0 : i32
    scf.if %2 {
      %c0_35 = arith.constant 0 : index
      %c0_36 = arith.constant 0 : index
      %40 = vector.load %arg3[%c0_35, %c0_36] : memref<16x128xf32, #tpu.memory_space<vmem>>, vector<16x128xf32>
      %c0_37 = arith.constant 0 : index
      %c0_38 = arith.constant 0 : index
      %41 = vector.load %arg21[%c0_37, %c0_38] : memref<16x128xf32, #tpu.memory_space<vmem>>, vector<16x128xf32>
      tpu.vector_store %arg21[%c0_37, %c0_38], %40 {strides = array<i32>} : memref<16x128xf32, #tpu.memory_space<vmem>>, vector<16x128xf32>,
      %c0_39 = arith.constant 0 : index
      %c0_40 = arith.constant 0 : index
      %42 = vector.load %arg6[%c0_39, %c0_40] : memref<2x128xf32, #tpu.memory_space<vmem>>, vector<2x128xf32>
      %c0_41 = arith.constant 0 : index
      %c0_42 = arith.constant 0 : index
      %43 = vector.load %arg22[%c0_41, %c0_42] : memref<2x128xf32, #tpu.memory_space<vmem>>, vector<2x128xf32>
      tpu.vector_store %arg22[%c0_41, %c0_42], %42 {strides = array<i32>} : memref<2x128xf32, #tpu.memory_space<vmem>>, vector<2x128xf32>,
    } else {
    }
    %c0 = arith.constant 0 : index
    %c0_1 = arith.constant 0 : index
    %3 = vector.load %arg21[%c0, %c0_1] : memref<16x128xf32, #tpu.memory_space<vmem>>, vector<16x128xf32>
    %c0_2 = arith.constant 0 : index
    %c0_3 = arith.constant 0 : index
    %4 = vector.load %arg4[%c0_2, %c0_3] : memref<16x2xf32, #tpu.memory_space<vmem>>, vector<16x2xf32>
    %c0_4 = arith.constant 0 : index
    %c0_5 = arith.constant 0 : index
    %5 = vector.load %arg22[%c0_4, %c0_5] : memref<2x128xf32, #tpu.memory_space<vmem>>, vector<2x128xf32>
    %cst = arith.constant dense<0.000000e+00> : vector<16x128xf32>
    %6 = tpu.matmul %4, %5, %cst {dimension_numbers = #tpu.dot_dimension_numbers<[1], [0], [0], [1], [0, 0, 1, 1], [], []>} : vector<16x2xf32>, vector<2x128xf32>, vector<16x128xf32> -> vector<16x128xf32>
    %7 = arith.addf %3, %6 : vector<16x128xf32>
    %c0_6 = arith.constant 0 : index
    %c0_7 = arith.constant 0 : index
    %8 = vector.load %arg21[%c0_6, %c0_7] : memref<16x128xf32, #tpu.memory_space<vmem>>, vector<16x128xf32>
    tpu.vector_store %arg21[%c0_6, %c0_7], %7 {strides = array<i32>} : memref<16x128xf32, #tpu.memory_space<vmem>>, vector<16x128xf32>,
    %cst_8 = arith.constant 0.000000e+00 : f32
    %9 = vector.broadcast %cst_8 : f32 to vector<16x128xf32>
    %c0_9 = arith.constant 0 : index
    %c0_10 = arith.constant 0 : index
    %10 = vector.load %arg23[%c0_9, %c0_10] : memref<16x128xf32, #tpu.memory_space<vmem>>, vector<16x128xf32>
    tpu.vector_store %arg23[%c0_9, %c0_10], %9 {strides = array<i32>} : memref<16x128xf32, #tpu.memory_space<vmem>>, vector<16x128xf32>,
    %c0_i32_11 = arith.constant 0 : i32
    %c32_i32 = arith.constant 32 : i32
    %11 = arith.addi %c0_i32_11, %c32_i32 : i32
    %c1_i32 = arith.constant 1 : i32
    scf.for %arg24 = %c0_i32_11 to %11 step %c1_i32  : i32 {
      %40 = arith.index_cast %arg24 : i32 to index
      %41 = memref.load %arg1[%40] : memref<32xi32, #tpu.memory_space<smem>>
      %42 = arith.index_cast %arg24 : i32 to index
      %43 = memref.load %arg2[%42] : memref<32xi32, #tpu.memory_space<smem>>
      %44 = arith.index_cast %41 : i32 to index
      %c0_35 = arith.constant 0 : index
      %45 = vector.load %arg21[%44, %c0_35] : memref<16x128xf32, #tpu.memory_space<vmem>>, vector<1x128xf32>
      %c0_36 = arith.constant 0 : index
      %46 = arith.index_cast %arg24 : i32 to index
      %c0_37 = arith.constant 0 : index
      %47 = vector.load %arg7[%c0_36, %46, %c0_37] : memref<1x32x128xf32, #tpu.memory_space<vmem>>, vector<1x1x128xf32>
      %48 = vector.shape_cast %47 : vector<1x1x128xf32> to vector<1x128xf32>
      %49 = arith.addf %45, %48 : vector<1x128xf32>
      %cst_38 = arith.constant 0.000000e+00 : f32
      %50 = vector.broadcast %cst_38 : f32 to vector<1x128xf32>
      %51 = arith.maximumf %49, %50 : vector<1x128xf32>
      %52 = arith.index_cast %43 : i32 to index
      %c0_39 = arith.constant 0 : index
      %53 = vector.load %arg23[%52, %c0_39] : memref<16x128xf32, #tpu.memory_space<vmem>>, vector<1x128xf32>
      %54 = arith.addf %53, %51 : vector<1x128xf32>
      %55 = arith.index_cast %43 : i32 to index
      %c0_40 = arith.constant 0 : index
      %56 = vector.load %arg23[%55, %c0_40] : memref<16x128xf32, #tpu.memory_space<vmem>>, vector<1x128xf32>
      tpu.vector_store %arg23[%55, %c0_40], %54 {strides = array<i32>} : memref<16x128xf32, #tpu.memory_space<vmem>>, vector<1x128xf32>,
    }
    %c32_i32_12 = arith.constant 32 : i32
    %c0_13 = arith.constant 0 : index
    %c0_14 = arith.constant 0 : index
    %c0_15 = arith.constant 0 : index
    %12 = vector.load %arg16[%c0_13, %c0_14, %c0_15] : memref<1x1x1xf32, #tpu.memory_space<vmem>>, vector<1x1x1xf32>
    %13 = vector.shape_cast %12 : vector<1x1x1xf32> to vector<1x1xf32>
    %14 = vector.broadcast %13 : vector<1x1xf32> to vector<16x128xf32>
    %15 = arith.mulf %14, %7 : vector<16x128xf32>
    %c0_16 = arith.constant 0 : index
    %c0_17 = arith.constant 0 : index
    %16 = vector.load %arg23[%c0_16, %c0_17] : memref<16x128xf32, #tpu.memory_space<vmem>>, vector<16x128xf32>
    %17 = arith.addf %15, %16 : vector<16x128xf32>
    %c0_18 = arith.constant 0 : index
    %c0_19 = arith.constant 0 : index
    %c0_20 = arith.constant 0 : index
    %18 = vector.load %arg8[%c0_18, %c0_19, %c0_20] : memref<1x128x128xf32, #tpu.memory_space<vmem>>, vector<1x128x128xf32>
    %19 = vector.shape_cast %18 : vector<1x128x128xf32> to vector<128x128xf32>
    %cst_21 = arith.constant dense<0.000000e+00> : vector<16x128xf32>
    %20 = tpu.matmul %17, %19, %cst_21 {dimension_numbers = #tpu.dot_dimension_numbers<[1], [0], [0], [1], [0, 0, 1, 1], [], []>} : vector<16x128xf32>, vector<128x128xf32>, vector<16x128xf32> -> vector<16x128xf32>
    %c0_22 = arith.constant 0 : index
    %c0_23 = arith.constant 0 : index
    %c0_24 = arith.constant 0 : index
    %21 = vector.load %arg9[%c0_22, %c0_23, %c0_24] : memref<1x1x128xf32, #tpu.memory_space<vmem>>, vector<1x1x128xf32>
    %22 = vector.shape_cast %21 : vector<1x1x128xf32> to vector<1x128xf32>
    %23 = vector.broadcast %22 : vector<1x128xf32> to vector<16x128xf32>
    %24 = arith.addf %20, %23 : vector<16x128xf32>
    %cst_25 = arith.constant 0.000000e+00 : f32
    %25 = vector.broadcast %cst_25 : f32 to vector<16x128xf32>
    %26 = arith.maximumf %24, %25 : vector<16x128xf32>
    %c0_26 = arith.constant 0 : index
    %c0_27 = arith.constant 0 : index
    %c0_28 = arith.constant 0 : index
    %27 = vector.load %arg10[%c0_26, %c0_27, %c0_28] : memref<1x128x128xf32, #tpu.memory_space<vmem>>, vector<1x128x128xf32>
    %28 = vector.shape_cast %27 : vector<1x128x128xf32> to vector<128x128xf32>
    %cst_29 = arith.constant dense<0.000000e+00> : vector<16x128xf32>
    %29 = tpu.matmul %26, %28, %cst_29 {dimension_numbers = #tpu.dot_dimension_numbers<[1], [0], [0], [1], [0, 0, 1, 1], [], []>} : vector<16x128xf32>, vector<128x128xf32>, vector<16x128xf32> -> vector<16x128xf32>
    %c0_30 = arith.constant 0 : index
    %c0_31 = arith.constant 0 : index
    %c0_32 = arith.constant 0 : index
    %30 = vector.load %arg11[%c0_30, %c0_31, %c0_32] : memref<1x1x128xf32, #tpu.memory_space<vmem>>, vector<1x1x128xf32>
    %31 = vector.shape_cast %30 : vector<1x1x128xf32> to vector<1x128xf32>
    %32 = vector.broadcast %31 : vector<1x128xf32> to vector<16x128xf32>
    %33 = arith.addf %29, %32 : vector<16x128xf32>
    %c4_i32 = arith.constant 4 : i32
    %34 = arith.cmpi eq, %arg0, %c4_i32 : i32
    %true = arith.constant true
    %35 = arith.xori %34, %true : i1
    %36 = arith.extui %35 : i1 to i32
    %c0_i32_33 = arith.constant 0 : i32
    %37 = arith.cmpi ne, %36, %c0_i32_33 : i32
    scf.if %37 {
      %c0_35 = arith.constant 0 : index
      %c0_36 = arith.constant 0 : index
      %40 = vector.load %arg5[%c0_35, %c0_36] : memref<2x16xf32, #tpu.memory_space<vmem>>, vector<2x16xf32>
      %c0_37 = arith.constant 0 : index
      %c0_38 = arith.constant 0 : index
      %41 = vector.load %arg21[%c0_37, %c0_38] : memref<16x128xf32, #tpu.memory_space<vmem>>, vector<16x128xf32>
      %cst_39 = arith.constant dense<0.000000e+00> : vector<2x128xf32>
      %42 = tpu.matmul %40, %41, %cst_39 {dimension_numbers = #tpu.dot_dimension_numbers<[1], [0], [0], [1], [0, 0, 1, 1], [], []>} : vector<2x16xf32>, vector<16x128xf32>, vector<2x128xf32> -> vector<2x128xf32>
      %c0_40 = arith.constant 0 : index
      %c0_41 = arith.constant 0 : index
      %43 = vector.load %arg22[%c0_40, %c0_41] : memref<2x128xf32, #tpu.memory_space<vmem>>, vector<2x128xf32>
      %44 = arith.addf %42, %43 : vector<2x128xf32>
      %c0_42 = arith.constant 0 : index
      %c0_43 = arith.constant 0 : index
      %c0_44 = arith.constant 0 : index
      %45 = vector.load %arg12[%c0_42, %c0_43, %c0_44] : memref<1x128x128xf32, #tpu.memory_space<vmem>>, vector<1x128x128xf32>
      %46 = vector.shape_cast %45 : vector<1x128x128xf32> to vector<128x128xf32>
      %cst_45 = arith.constant dense<0.000000e+00> : vector<2x128xf32>
      %47 = tpu.matmul %44, %46, %cst_45 {dimension_numbers = #tpu.dot_dimension_numbers<[1], [0], [0], [1], [0, 0, 1, 1], [], []>} : vector<2x128xf32>, vector<128x128xf32>, vector<2x128xf32> -> vector<2x128xf32>
      %c0_46 = arith.constant 0 : index
      %c0_47 = arith.constant 0 : index
      %c0_48 = arith.constant 0 : index
      %48 = vector.load %arg13[%c0_46, %c0_47, %c0_48] : memref<1x1x128xf32, #tpu.memory_space<vmem>>, vector<1x1x128xf32>
      %49 = vector.shape_cast %48 : vector<1x1x128xf32> to vector<1x128xf32>
      %50 = vector.broadcast %49 : vector<1x128xf32> to vector<2x128xf32>
      %51 = arith.addf %47, %50 : vector<2x128xf32>
      %cst_49 = arith.constant 0.000000e+00 : f32
      %52 = vector.broadcast %cst_49 : f32 to vector<2x128xf32>
      %53 = arith.maximumf %51, %52 : vector<2x128xf32>
      %c0_50 = arith.constant 0 : index
      %c0_51 = arith.constant 0 : index
      %c0_52 = arith.constant 0 : index
      %54 = vector.load %arg14[%c0_50, %c0_51, %c0_52] : memref<1x128x128xf32, #tpu.memory_space<vmem>>, vector<1x128x128xf32>
      %55 = vector.shape_cast %54 : vector<1x128x128xf32> to vector<128x128xf32>
      %cst_53 = arith.constant dense<0.000000e+00> : vector<2x128xf32>
      %56 = tpu.matmul %53, %55, %cst_53 {dimension_numbers = #tpu.dot_dimension_numbers<[1], [0], [0], [1], [0, 0, 1, 1], [], []>} : vector<2x128xf32>, vector<128x128xf32>, vector<2x128xf32> -> vector<2x128xf32>
      %c0_54 = arith.constant 0 : index
      %c0_55 = arith.constant 0 : index
      %c0_56 = arith.constant 0 : index
      %57 = vector.load %arg15[%c0_54, %c0_55, %c0_56] : memref<1x1x128xf32, #tpu.memory_space<vmem>>, vector<1x1x128xf32>
      %58 = vector.shape_cast %57 : vector<1x1x128xf32> to vector<1x128xf32>
      %59 = vector.broadcast %58 : vector<1x128xf32> to vector<2x128xf32>
      %60 = arith.addf %56, %59 : vector<2x128xf32>
      %cst_57 = arith.constant 0.000000e+00 : f32
      %61 = vector.broadcast %cst_57 : f32 to vector<2x128xf32>
      %62 = arith.maximumf %60, %61 : vector<2x128xf32>
      %c0_58 = arith.constant 0 : index
      %c0_59 = arith.constant 0 : index
      %63 = vector.load %arg22[%c0_58, %c0_59] : memref<2x128xf32, #tpu.memory_space<vmem>>, vector<2x128xf32>
      tpu.vector_store %arg22[%c0_58, %c0_59], %62 {strides = array<i32>} : memref<2x128xf32, #tpu.memory_space<vmem>>, vector<2x128xf32>,
      %cst_60 = arith.constant 0.000000e+00 : f32
      %64 = vector.broadcast %cst_60 : f32 to vector<16x128xf32>
      %65 = arith.maximumf %33, %64 : vector<16x128xf32>
      %c0_61 = arith.constant 0 : index
      %c0_62 = arith.constant 0 : index
      %66 = vector.load %arg21[%c0_61, %c0_62] : memref<16x128xf32, #tpu.memory_space<vmem>>, vector<16x128xf32>
      tpu.vector_store %arg21[%c0_61, %c0_62], %65 {strides = array<i32>} : memref<16x128xf32, #tpu.memory_space<vmem>>, vector<16x128xf32>,
    } else {
    }
    %38 = arith.extui %34 : i1 to i32
    %c0_i32_34 = arith.constant 0 : i32
    %39 = arith.cmpi ne, %38, %c0_i32_34 : i32
    scf.if %39 {
      %c0_35 = arith.constant 0 : index
      %c0_36 = arith.constant 0 : index
      %40 = vector.load %arg5[%c0_35, %c0_36] : memref<2x16xf32, #tpu.memory_space<vmem>>, vector<2x16xf32>
      %cst_37 = arith.constant dense<0.000000e+00> : vector<2x128xf32>
      %41 = tpu.matmul %40, %33, %cst_37 {dimension_numbers = #tpu.dot_dimension_numbers<[1], [0], [0], [1], [0, 0, 1, 1], [], []>} : vector<2x16xf32>, vector<16x128xf32>, vector<2x128xf32> -> vector<2x128xf32>
      %c0_38 = arith.constant 0 : index
      %c0_39 = arith.constant 0 : index
      %42 = vector.load %arg17[%c0_38, %c0_39] : memref<2x1xf32, #tpu.memory_space<vmem>>, vector<2x1xf32>
      %43 = vector.broadcast %42 : vector<2x1xf32> to vector<2x128xf32>
      %44 = arith.mulf %41, %43 : vector<2x128xf32>
      %c0_40 = arith.constant 0 : index
      %c0_41 = arith.constant 0 : index
      %45 = vector.load %arg18[%c0_40, %c0_41] : memref<128x128xf32, #tpu.memory_space<vmem>>, vector<128x128xf32>
      %cst_42 = arith.constant dense<0.000000e+00> : vector<2x128xf32>
      %46 = tpu.matmul %44, %45, %cst_42 {dimension_numbers = #tpu.dot_dimension_numbers<[1], [0], [0], [1], [0, 0, 1, 1], [], []>} : vector<2x128xf32>, vector<128x128xf32>, vector<2x128xf32> -> vector<2x128xf32>
      %c0_43 = arith.constant 0 : index
      %c0_44 = arith.constant 0 : index
      %47 = vector.load %arg19[%c0_43, %c0_44] : memref<1x128xf32, #tpu.memory_space<vmem>>, vector<1x128xf32>
      %48 = vector.broadcast %47 : vector<1x128xf32> to vector<2x128xf32>
      %49 = arith.addf %46, %48 : vector<2x128xf32>
      %c0_45 = arith.constant 0 : index
      %c0_46 = arith.constant 0 : index
      %50 = vector.load %arg20[%c0_45, %c0_46] : memref<2x128xf32, #tpu.memory_space<vmem>>, vector<2x128xf32>
      tpu.vector_store %arg20[%c0_45, %c0_46], %49 {strides = array<i32>} : memref<2x128xf32, #tpu.memory_space<vmem>>, vector<2x128xf32>,
    } else {
    }
    return
  }
  func.func @transform_0(%arg0: i32, %arg1: memref<32xi32, #tpu.memory_space<smem>>, %arg2: memref<32xi32, #tpu.memory_space<smem>>) -> (i32, i32) {
    %c0_i32 = arith.constant 0 : i32
    %c0_i32_0 = arith.constant 0 : i32
    %c0_i32_1 = arith.constant 0 : i32
    return %c0_i32, %c0_i32_0 : i32, i32
  }
  func.func @transform_1(%arg0: i32, %arg1: memref<32xi32, #tpu.memory_space<smem>>, %arg2: memref<32xi32, #tpu.memory_space<smem>>) -> (i32, i32) {
    %c0_i32 = arith.constant 0 : i32
    %c0_i32_0 = arith.constant 0 : i32
    %c0_i32_1 = arith.constant 0 : i32
    return %c0_i32, %c0_i32_0 : i32, i32
  }
  func.func @transform_2(%arg0: i32, %arg1: memref<32xi32, #tpu.memory_space<smem>>, %arg2: memref<32xi32, #tpu.memory_space<smem>>) -> (i32, i32) {
    %c0_i32 = arith.constant 0 : i32
    %c0_i32_0 = arith.constant 0 : i32
    %c0_i32_1 = arith.constant 0 : i32
    return %c0_i32, %c0_i32_0 : i32, i32
  }
  func.func @transform_3(%arg0: i32, %arg1: memref<32xi32, #tpu.memory_space<smem>>, %arg2: memref<32xi32, #tpu.memory_space<smem>>) -> (i32, i32) {
    %c0_i32 = arith.constant 0 : i32
    %c0_i32_0 = arith.constant 0 : i32
    %c0_i32_1 = arith.constant 0 : i32
    return %c0_i32, %c0_i32_0 : i32, i32
  }
  func.func @transform_4(%arg0: i32, %arg1: memref<32xi32, #tpu.memory_space<smem>>, %arg2: memref<32xi32, #tpu.memory_space<smem>>) -> (i32, i32, i32) {
    %c0_i32 = arith.constant 0 : i32
    %c0_i32_0 = arith.constant 0 : i32
    %c0_i32_1 = arith.constant 0 : i32
    return %arg0, %c0_i32, %c0_i32_0 : i32, i32, i32
  }
  func.func @transform_5(%arg0: i32, %arg1: memref<32xi32, #tpu.memory_space<smem>>, %arg2: memref<32xi32, #tpu.memory_space<smem>>) -> (i32, i32, i32) {
    %c0_i32 = arith.constant 0 : i32
    %c0_i32_0 = arith.constant 0 : i32
    %c0_i32_1 = arith.constant 0 : i32
    return %arg0, %c0_i32, %c0_i32_0 : i32, i32, i32
  }
  func.func @transform_6(%arg0: i32, %arg1: memref<32xi32, #tpu.memory_space<smem>>, %arg2: memref<32xi32, #tpu.memory_space<smem>>) -> (i32, i32, i32) {
    %c0_i32 = arith.constant 0 : i32
    %c0_i32_0 = arith.constant 0 : i32
    %c0_i32_1 = arith.constant 0 : i32
    return %arg0, %c0_i32, %c0_i32_0 : i32, i32, i32
  }
  func.func @transform_7(%arg0: i32, %arg1: memref<32xi32, #tpu.memory_space<smem>>, %arg2: memref<32xi32, #tpu.memory_space<smem>>) -> (i32, i32, i32) {
    %c0_i32 = arith.constant 0 : i32
    %c0_i32_0 = arith.constant 0 : i32
    %c0_i32_1 = arith.constant 0 : i32
    return %arg0, %c0_i32, %c0_i32_0 : i32, i32, i32
  }
  func.func @transform_8(%arg0: i32, %arg1: memref<32xi32, #tpu.memory_space<smem>>, %arg2: memref<32xi32, #tpu.memory_space<smem>>) -> (i32, i32, i32) {
    %c0_i32 = arith.constant 0 : i32
    %c0_i32_0 = arith.constant 0 : i32
    %c0_i32_1 = arith.constant 0 : i32
    return %arg0, %c0_i32, %c0_i32_0 : i32, i32, i32
  }
  func.func @transform_9(%arg0: i32, %arg1: memref<32xi32, #tpu.memory_space<smem>>, %arg2: memref<32xi32, #tpu.memory_space<smem>>) -> (i32, i32, i32) {
    %c0_i32 = arith.constant 0 : i32
    %c0_i32_0 = arith.constant 0 : i32
    %c0_i32_1 = arith.constant 0 : i32
    return %arg0, %c0_i32, %c0_i32_0 : i32, i32, i32
  }
  func.func @transform_10(%arg0: i32, %arg1: memref<32xi32, #tpu.memory_space<smem>>, %arg2: memref<32xi32, #tpu.memory_space<smem>>) -> (i32, i32, i32) {
    %c0_i32 = arith.constant 0 : i32
    %c0_i32_0 = arith.constant 0 : i32
    %c0_i32_1 = arith.constant 0 : i32
    return %arg0, %c0_i32, %c0_i32_0 : i32, i32, i32
  }
  func.func @transform_11(%arg0: i32, %arg1: memref<32xi32, #tpu.memory_space<smem>>, %arg2: memref<32xi32, #tpu.memory_space<smem>>) -> (i32, i32, i32) {
    %c0_i32 = arith.constant 0 : i32
    %c0_i32_0 = arith.constant 0 : i32
    %c0_i32_1 = arith.constant 0 : i32
    return %arg0, %c0_i32, %c0_i32_0 : i32, i32, i32
  }
  func.func @transform_12(%arg0: i32, %arg1: memref<32xi32, #tpu.memory_space<smem>>, %arg2: memref<32xi32, #tpu.memory_space<smem>>) -> (i32, i32, i32) {
    %c0_i32 = arith.constant 0 : i32
    %c0_i32_0 = arith.constant 0 : i32
    %c0_i32_1 = arith.constant 0 : i32
    return %arg0, %c0_i32, %c0_i32_0 : i32, i32, i32
  }
  func.func @transform_13(%arg0: i32, %arg1: memref<32xi32, #tpu.memory_space<smem>>, %arg2: memref<32xi32, #tpu.memory_space<smem>>) -> (i32, i32, i32) {
    %c0_i32 = arith.constant 0 : i32
    %c0_i32_0 = arith.constant 0 : i32
    %c0_i32_1 = arith.constant 0 : i32
    return %arg0, %c0_i32, %c0_i32_0 : i32, i32, i32
  }
  func.func @transform_14(%arg0: i32, %arg1: memref<32xi32, #tpu.memory_space<smem>>, %arg2: memref<32xi32, #tpu.memory_space<smem>>) -> (i32, i32) {
    %c0_i32 = arith.constant 0 : i32
    %c0_i32_0 = arith.constant 0 : i32
    %c0_i32_1 = arith.constant 0 : i32
    return %c0_i32, %c0_i32_0 : i32, i32
  }
  func.func @transform_15(%arg0: i32, %arg1: memref<32xi32, #tpu.memory_space<smem>>, %arg2: memref<32xi32, #tpu.memory_space<smem>>) -> (i32, i32) {
    %c0_i32 = arith.constant 0 : i32
    %c0_i32_0 = arith.constant 0 : i32
    %c0_i32_1 = arith.constant 0 : i32
    return %c0_i32, %c0_i32_0 : i32, i32
  }
  func.func @transform_16(%arg0: i32, %arg1: memref<32xi32, #tpu.memory_space<smem>>, %arg2: memref<32xi32, #tpu.memory_space<smem>>) -> (i32, i32) {
    %c0_i32 = arith.constant 0 : i32
    %c0_i32_0 = arith.constant 0 : i32
    %c0_i32_1 = arith.constant 0 : i32
    return %c0_i32, %c0_i32_0 : i32, i32
  }
  func.func @transform_17(%arg0: i32, %arg1: memref<32xi32, #tpu.memory_space<smem>>, %arg2: memref<32xi32, #tpu.memory_space<smem>>) -> (i32, i32) {
    %c0_i32 = arith.constant 0 : i32
    %c0_i32_0 = arith.constant 0 : i32
    %c0_i32_1 = arith.constant 0 : i32
    return %c0_i32, %c0_i32_0 : i32, i32
  }
}

</mosaic_0001>

<bundles_post_ra>
// kernel: gnn_forward.1
= control target key start
LH: loop header
LB: loop body
LE: loop exit
PB: predicated region body
PF: predicated region fallthrough
CT: control target
= control target key end

     0   :  { %s2488_s0 = inlined_call_operand.vmem [shape: s32[32], index: 0, kind: input, shape index: {}]   ;;  %s2489_s2 = inlined_call_operand.vmem [shape: f32[16,128], index: 2, kind: input, shape index: {}]   ;;  %s2490_s3 = inlined_call_operand.vmem [shape: f32[16,2], index: 3, kind: input, shape index: {}]   ;;  %s2491_s4 = inlined_call_operand.vmem [shape: f32[2,16], index: 4, kind: input, shape index: {}]   ;;  %s2492_s5 = inlined_call_operand.vmem [shape: f32[2,128], index: 5, kind: input, shape index: {}]   ;;  %s2493_s6 = inlined_call_operand.vmem [shape: f32[5,32,128], index: 6, kind: input, shape index: {}]   ;;  %s2494_s7 = inlined_call_operand.vmem [shape: f32[5,128,128], index: 7, kind: input, shape index: {}]   ;;  %s2495_s8 = inlined_call_operand.vmem [shape: f32[5,1,128], index: 8, kind: input, shape index: {}]   ;;  %s2496_s9 = inlined_call_operand.vmem [shape: f32[5,128,128], index: 9, kind: input, shape index: {}]   ;;  %s2497_s10 = inlined_call_operand.vmem [shape: f32[5,1,128], index: 10, kind: input, shape index: {}]   ;;  %s2498_s11 = inlined_call_operand.vmem [shape: f32[5,128,128], index: 11, kind: input, shape index: {}]   ;;  %s2499_s12 = inlined_call_operand.vmem [shape: f32[5,1,128], index: 12, kind: input, shape index: {}]   ;;  %s2500_s13 = inlined_call_operand.vmem [shape: f32[5,128,128], index: 13, kind: input, shape index: {}]   ;;  %s2501_s14 = inlined_call_operand.vmem [shape: f32[5,1,128], index: 14, kind: input, shape index: {}]   ;;  %s2502_s15 = inlined_call_operand.vmem [shape: f32[5,1,1], index: 15, kind: input, shape index: {}]   ;;  %s2503_s16 = inlined_call_operand.vmem [shape: f32[2,1], index: 16, kind: input, shape index: {}]   ;;  %s2504_s17 = inlined_call_operand.vmem [shape: f32[128,128], index: 17, kind: input, shape index: {}]   ;;  %s2505_s18 = inlined_call_operand.vmem [shape: f32[1,128], index: 18, kind: input, shape index: {}]   ;;  %s2506_s19 = inlined_call_operand.hbm [shape: f32[2,128], index: 19, kind: output, shape index: {}]   ;;  %s2507_s1 = inlined_call_operand.vmem [shape: s32[32], index: 1, kind: input, shape index: {}]  }
   0x1   :  { %2511 = sst [smem:[#allocation13_spill]] %s2488_s0  ;;  %s28_s22 = sshll.u32 %s2507_s1, 4  ;;  %s29_s22 = int_to_ptr.vmem [resolvable:$true] %s28_s22 }
   0x2   :  { %2512 = sst [smem:[#allocation14_spill]] %s2489_s2 }
   0x3   :  { %2513 = sst [smem:[#allocation15_spill]] %s2490_s3 }
   0x4   :  { %2514 = sst [smem:[#allocation16_spill]] %s2491_s4 }
   0x5   :  { %2515 = sst [smem:[#allocation17_spill]] %s2492_s5 }
   0x6   :  { %2516 = sst [smem:[#allocation18_spill]] %s2493_s6 }
   0x7   :  { %2517 = sst [smem:[#allocation19_spill]] %s2494_s7 }
   0x8   :  { %2518 = sst [smem:[#allocation20_spill]] %s2496_s9 }
   0x9   :  { %2519 = sst [smem:[#allocation21_spill]] %s2506_s19 }
   0xa   :  { %s2520_s20 = sld [smem:[#allocation13_spill]] }
  0x10   :  { %s24_s5 = sshll.u32 %s2520_s20, 4  ;;  %s25_s5 = int_to_ptr.vmem [resolvable:$true] %s24_s5 }
  0x11   :  { %s1999_s3 = scalar_lea.vmem %s25_s5, 16  ;;  %p2004_p1 = scmp.lt.s32.totalorder %s25_s5, %s25_s5 }
  0x12   :  { %p2000_p0 = scmp.ne.s32.totalorder %s25_s5, %s1999_s3  ;;  %p2005_p2 = scmp.lt.s32.totalorder %s1999_s3, %s1999_s3 }
  0x14   :  { %p2006_p3 = por %p2005_p2, %p2004_p1 }
  0x16   :  { %p2007_p4 = pnand %p2006_p3, %p2000_p0 }
  0x18   :  { %2010 = shalt.err (!%p2007_p4)  }
  0x19   :  { %s2069_s23 = smov [#allocation6]   ;;  %s2011_s24 = scalar_lea.vmem %s29_s22, 16 }
  0x1a   :  { %27 = dma.vmem_to_smem %s25_s5, 16, %s2069_s23, [#allocation5] }
  0x1b   :  { %p2012_p5 = scmp.ne.s32.totalorder %s29_s22, %s2011_s24  ;;  %p2016_p6 = scmp.lt.s32.totalorder %s29_s22, %s29_s22 }
  0x1c   :  { %p2017_p7 = scmp.lt.s32.totalorder %s2011_s24, %s2011_s24 }
  0x1e   :  { %p2018_p8 = por %p2017_p7, %p2016_p6 }
  0x20   :  { %p2019_p9 = pnand %p2018_p8, %p2012_p5 }
  0x22   :  { %2022 = shalt.err (!%p2019_p9)  }
  0x23   :  { %s2070_s25 = smov [#allocation7]  }
  0x24   :  { %31 = dma.vmem_to_smem %s29_s22, 16, %s2070_s25, [#allocation5] }
  0x25   :  { %2055 = dma.done.wait [#allocation5], 32 }
  0x26   :  { %2056 = vsyncadd [#allocation5], 4294967264 }
  0x27   :  { %33 = sfence }
  0x28   :  { %34 = vsyncpa [#allocation9], 0  ;;  %s2185_s1 = smov 0  }
  0x29 LB: > { %2521 = sst [smem:[#allocation12_spill]] %s2063_s1  ;;  %s2191_s5 = sadd.s32 4294967295, %s2063_s1   ;;  %s2063_s1 = sphi %s2185_s1, %s40_s1  }
  0x2a   : > { %p1641_p10 = scmp.ge.s32.totalorder %s2063_s1, 1  ;;  %p575_p11 = scmp.lt.s32.totalorder %s2063_s1, 6 }
  0x2c   : > { %p576_p12 = pnand %p1641_p10, %p575_p11 }
  0x2d   : > { %p657_p13 = scmp.lt.s32.totalorder (!%p576_p12), %s2191_s5, 4  ;;  %s2522_s6 = sld [smem:[#allocation18_spill]] (!%p576_p12) }
  0x2e   : > { %579 = sbr.rel (%p576_p12) target bundleno = 1822 (0x71e), region = 88  ;;  %s2523_s7 = sld [smem:[#allocation19_spill]] (!%p576_p12) }
  0x2f   : > { %s2524_s9 = sld [smem:[#allocation20_spill]] (!%p576_p12)  ;;  %p1652_p0 = scmp.ne.s32.totalorder (!%p576_p12), %s2191_s5, 0 }
  0x33   : > { %s2197_s4 = scalar_select %p657_p13, %s2191_s5, 4 }
  0x34   : > { %s2525_s30 = sld [smem:[#allocation14_spill]] (!%p1652_p0) }
  0x35   : > { %s1670_s26 = sshll.u32 %s2197_s4, 5  ;;  %s1671_s27 = sshll.u32 %s2197_s4, 7 }
  0x36   : > { %s2204_s0 = scalar_lea.vmem %s2522_s6, %s1670_s26  ;;  %s2209_s21 = scalar_lea.vmem %s2523_s7, %s1671_s27 }
  0x37   : > { %s2218_s25 = scalar_lea.vmem %s2524_s9, %s1671_s27  ;;  %s2227_s6 = scalar_lea.vmem %s2498_s11, %s1671_s27 }
  0x38   : > { %s2236_s3 = scalar_lea.vmem %s2500_s13, %s1671_s27  ;;  %s693_s9 = scalar_lea.vmem %s2501_s14, %s2197_s4 }
  0x39   : > { %s696_s28 = scalar_lea.vmem %s2502_s15, %s2197_s4  ;;  %700 = sbr.rel (%p1652_p0) target bundleno = 66 (0x42), region = 92 }
  0x3a   : > { %s2526_s22 = sld [smem:[#allocation17_spill]] (!%p1652_p0) }
  0x3e   : > { %v701_v0 = vld [vmem:[%s2525_s30] sm:$0xff]  ;;  %v702_v1 = vld [vmem:[%s2525_s30 + $0x8] sm:$0xff] }
  0x3f   : > { %703 = vst [vmem:[#allocation2] sm:$0xff] %v701_v0  ;;  %704 = vst [vmem:[#allocation2 + $0x8] sm:$0xff] %v702_v1 }
  0x40   : > { %v705_v2 = vld [vmem:[%s2526_s22] sm:$0x3] }
  0x41   : > { %706 = vst [vmem:[#allocation3] sm:$0x3] %v705_v2 }
  0x42 PF: > { %vm719_vm0 = vcmask 1041408   ;;  %s2527_s19 = sld [smem:[#allocation15_spill]]  ;;  %vm712_vm1 = vcmask 15360   ;;  %v2071_v6 = vmov 0.0   ;;  %s2065_s7 = smov 0  }
  0x43   : > { %802 = vst [vmem:[#allocation4] sm:$0xff] %v2071_v6  ;;  %803 = vst [vmem:[#allocation4 + $0x8] sm:$0xff] %v2071_v6 }
  0x46   : > { %v708_v7 = vld [vmem:[#allocation2 + $0x8] sm:$0xff]  ;;  %v707_v9 = vld [vmem:[#allocation2] sm:$0xff] }
  0x48   : > { %v711_v3 = vld [vmem:[#allocation3] sm:$0x3]  ;;  %v709_v4 = vld [vmem:[%s2527_s19] sm:$0xff]  ;;  %v710_v5 = vld [vmem:[%s2527_s19 + $0x8] sm:$0xff] }
  0x49   : > { %1771 = vmatprep.subr.msk.mxu0 %vm719_vm0, %v711_v3  ;;  %1773 = vmatprep.mubr.msk.f32.mxu0 %vm712_vm1, %v709_v4 }
  0x4a   : > { %1772 = vmatpush3.msk.msra.mxu0 %vm719_vm0, %v711_v3 }
  0x4b   : > { %1774 = vmatmul.mubr.msk.f32.vlgmr.msra.gmra.mxu0 %vm712_vm1, %v710_v5 }
 0x10b   : > { %v1775_v8 = vpop.f32.mrf.mxu0 }
 0x10c   : > { %v2262_v10 = vadd.f32 %v1775_v8, %v708_v7 }
 0x10d   : > { %v789_v11 = vpop.f32.mrf.mxu0 }
 0x10e   : > { %801 = vst [vmem:[#allocation2 + $0x8] sm:$0xff] %v2262_v10  ;;  %v2265_v12 = vadd.f32 %v789_v11, %v707_v9 }
 0x110   : > { %800 = vst [vmem:[#allocation2] sm:$0xff] %v2265_v12 }
 0x111 LB: >> { %s810_s29 = sld [smem:[#allocation6 + %s2067_s7]]  ;;  %s814_s27 = scalar_lea.vmem %s2204_s0, %s2067_s7  ;;  %s2067_s7 = sphi %s2065_s7, %s809_s7  }
 0x112   : >> { %s811_s20 = sld [smem:[#allocation7 + %s2067_s7]]  ;;  %v815_v13 = vld [vmem:[%s814_s27] sm:$0x1]  ;;  %s809_s7 = sadd.s32 1, %s2067_s7  }
 0x113   : >> { %p806_p1 = scmp.ge.s32.totalorder %s809_s7, 32  }
 0x114   : > { %v1656_v19 = vld [vmem:[%s696_s28] ss:$0 sm:$0xff] (%p806_p1)  ;;  %v853_v20 = vld [vmem:[%s2209_s21 + $0x78] sm:$0xff] (%p806_p1)  ;;  %v852_v21 = vld [vmem:[%s2209_s21 + $0x70] sm:$0xff] (%p806_p1)  ;;  %v2072_v22 = vmov (%p806_p1), 0   ;;  %s2528_s28 = scalar_lea.vmem (%p806_p1), %s2495_s8, %s2197_s4  ;;  %p1659_p2 = scmp.eq.s32.totalorder (%p806_p1), %s2191_s5, 4 }
 0x115   : > { %1997 = vset.pattern.permute.xlu0 (%p806_p1), %v2072_v22  ;;  %1776 = vmatprep.subr.mxu1 (%p806_p1), %v853_v20  ;;  %v851_v23 = vld [vmem:[%s2209_s21 + $0x68] sm:$0xff] (%p806_p1)  ;;  %v850_v24 = vld [vmem:[%s2209_s21 + $0x60] sm:$0xff] (%p806_p1)  ;;  %v849_v25 = vld [vmem:[%s2209_s21 + $0x58] sm:$0xff] (%p806_p1) }
 0x116   : > { %829 = vperm.xlu0 (%p806_p1), %1997, %v1656_v19   ;;  %1777 = vmatpush3.msra.mxu1 (%p806_p1), %v853_v20  ;;  %v953_v26 = vld [vmem:[%s2218_s25 + $0x78] sm:$0xff] (%p806_p1)  ;;  %v952_v27 = vld [vmem:[%s2218_s25 + $0x70] sm:$0xff] (%p806_p1)  ;;  %v951_v29 = vld [vmem:[%s2218_s25 + $0x68] sm:$0xff] (%p806_p1) }
 0x117   : >> { %s812_s2 = scalar_lea.vmem [#allocation2], %s810_s29  ;;  %1778 = vmatprep.subr.mxu1 (%p806_p1), %v852_v21  ;;  %1811 = vmatprep.subr.mxu0 (%p806_p1), %v953_v26  ;;  %v848_v28 = vld [vmem:[%s2209_s21 + $0x50] sm:$0xff] (%p806_p1)  ;;  %v847_v30 = vld [vmem:[%s2209_s21 + $0x48] sm:$0xff] (%p806_p1)  ;;  %v950_v31 = vld [vmem:[%s2218_s25 + $0x60] sm:$0xff] (%p806_p1) }
 0x118   : >> { %v813_v14 = vld [vmem:[%s812_s2] sm:$0x1]  ;;  %s818_s22 = scalar_lea.vmem [#allocation4], %s811_s20  ;;  %1779 = vmatpush3.msra.mxu1 (%p806_p1), %v852_v21  ;;  %1812 = vmatpush3.msra.mxu0 (%p806_p1), %v953_v26  ;;  %v949_v33 = vld [vmem:[%s2218_s25 + $0x58] sm:$0xff] (%p806_p1)  ;;  %v948_v35 = vld [vmem:[%s2218_s25 + $0x50] sm:$0xff] (%p806_p1) }
 0x119   : >> { %v816_v15 = vadd.f32 %v815_v13, %v813_v14  ;;  %v819_v16 = vld [vmem:[%s818_s22] sm:$0x1]  ;;  %1780 = vmatprep.subr.mxu1 (%p806_p1), %v851_v23  ;;  %1813 = vmatprep.subr.mxu0 (%p806_p1), %v952_v27  ;;  %v845_v34 = vld [vmem:[%s2209_s21 + $0x38] sm:$0xff] (%p806_p1)  ;;  %v844_v36 = vld [vmem:[%s2209_s21 + $0x30] sm:$0xff] (%p806_p1) }
 0x11a   : > { %1781 = vmatpush3.msra.mxu1 (%p806_p1), %v851_v23  ;;  %1814 = vmatpush3.msra.mxu0 (%p806_p1), %v952_v27  ;;  %v846_v32 = vld [vmem:[%s2209_s21 + $0x40] sm:$0xff] (%p806_p1)  ;;  %v947_v37 = vld [vmem:[%s2218_s25 + $0x48] sm:$0xff] (%p806_p1)  ;;  %v945_v41 = vld [vmem:[%s2218_s25 + $0x38] sm:$0xff] (%p806_p1) }
 0x11b   : >> { %v817_v17 = vmax.f32 %v816_v15, 0.0  ;;  %808 = sbr.rel (!%p806_p1) target bundleno = 273 (0x111), region = 164  ;;  %1782 = vmatprep.subr.mxu1 (%p806_p1), %v850_v24  ;;  %1815 = vmatprep.subr.mxu0 (%p806_p1), %v951_v29  ;;  %v843_v38 = vld [vmem:[%s2209_s21 + $0x28] sm:$0xff] (%p806_p1)  ;;  %v946_v39 = vld [vmem:[%s2218_s25 + $0x40] sm:$0xff] (%p806_p1)  ;;  %v841_v42 = vld [vmem:[%s2209_s21 + $0x18] sm:$0xff] (%p806_p1) }
 0x11c   : > { %1783 = vmatpush3.msra.mxu1 (%p806_p1), %v850_v24  ;;  %1816 = vmatpush3.msra.mxu0 (%p806_p1), %v951_v29  ;;  %v842_v40 = vld [vmem:[%s2209_s21 + $0x20] sm:$0xff] (%p806_p1)  ;;  %v944_v43 = vld [vmem:[%s2218_s25 + $0x30] sm:$0xff] (%p806_p1)  ;;  %v943_v45 = vld [vmem:[%s2218_s25 + $0x28] sm:$0xff] (%p806_p1) }
 0x11d   : >> { %v820_v18 = vadd.f32 %v819_v16, %v817_v17  ;;  %1784 = vmatprep.subr.mxu1 (%p806_p1), %v849_v25  ;;  %1817 = vmatprep.subr.mxu0 (%p806_p1), %v950_v31  ;;  %v840_v44 = vld [vmem:[%s2209_s21 + $0x10] sm:$0xff] (%p806_p1)  ;;  %v839_v46 = vld [vmem:[%s2209_s21 + $0x8] sm:$0xff] (%p806_p1)  ;;  %v942_v47 = vld [vmem:[%s2218_s25 + $0x20] sm:$0xff] (%p806_p1) }
 0x11e   : > { %1785 = vmatpush3.msra.mxu1 (%p806_p1), %v849_v25  ;;  %1818 = vmatpush3.msra.mxu0 (%p806_p1), %v950_v31  ;;  %v838_v48 = vld [vmem:[%s2209_s21] sm:$0xff] (%p806_p1)  ;;  %v941_v56 = vld [vmem:[%s2218_s25 + $0x18] sm:$0xff] (%p806_p1)  ;;  %v940_v57 = vld [vmem:[%s2218_s25 + $0x10] sm:$0xff] (%p806_p1) }
 0x11f   : >> { %821 = vst [vmem:[%s818_s22] sm:$0x1] %v820_v18  ;;  %1786 = vmatprep.subr.mxu1 (%p806_p1), %v848_v28  ;;  %1819 = vmatprep.subr.mxu0 (%p806_p1), %v949_v33  ;;  %v939_v58 = vld [vmem:[%s2218_s25 + $0x8] sm:$0xff] (%p806_p1)  ;;  %v938_v59 = vld [vmem:[%s2218_s25] sm:$0xff] (%p806_p1)  ;;  %s2529_s25 = scalar_lea.vmem (%p806_p1), %s2497_s10, %s2197_s4 }
 0x120   : > { %1787 = vmatpush3.msra.mxu1 %v848_v28  ;;  %1820 = vmatpush3.msra.mxu0 %v949_v33  ;;  %v1657_v60 = vld [vmem:[%s2528_s28] ss:$0 sm:$0xff]  ;;  %s2530_s20 = sld [smem:[#allocation16_spill]] (!%p1659_p2)  ;;  %s2531_s2 = scalar_lea.vmem (!%p1659_p2), %s2499_s12, %s2197_s4 }
 0x121   : > { %1788 = vmatprep.subr.mxu1 %v847_v30  ;;  %1821 = vmatprep.subr.mxu0 %v948_v35  ;;  %v1658_v3 = vld [vmem:[%s2529_s25] ss:$0 sm:$0xff] }
 0x122   : > { %1789 = vmatpush3.msra.mxu1 %v847_v30  ;;  %1822 = vmatpush3.msra.mxu0 %v948_v35 }
 0x123   : > { %1790 = vmatprep.subr.mxu1 %v846_v32  ;;  %1823 = vmatprep.subr.mxu0 %v947_v37 }
 0x124   : > { %1791 = vmatpush3.msra.mxu1 %v846_v32  ;;  %1824 = vmatpush3.msra.mxu0 %v947_v37 }
 0x125   : > { %1792 = vmatprep.subr.mxu1 %v845_v34  ;;  %1825 = vmatprep.subr.mxu0 %v946_v39 }
 0x126   : > { %1793 = vmatpush3.msra.mxu1 %v845_v34  ;;  %1826 = vmatpush3.msra.mxu0 %v946_v39  ;;  %v835_v49 = vld [vmem:[#allocation4 + $0x8] sm:$0xff]  ;;  %v834_v51 = vld [vmem:[#allocation4] sm:$0xff] }
 0x127   : > { %1794 = vmatprep.subr.mxu1 %v844_v36  ;;  %1827 = vmatprep.subr.mxu0 %v945_v41 }
 0x128   : > { %1795 = vmatpush3.msra.mxu1 %v844_v36  ;;  %1828 = vmatpush3.msra.mxu0 %v945_v41 }
 0x129   : > { %1796 = vmatprep.subr.mxu1 %v843_v38  ;;  %1829 = vmatprep.subr.mxu0 %v944_v43 }
 0x12a   : > { %1797 = vmatpush3.msra.mxu1 %v843_v38  ;;  %1830 = vmatpush3.msra.mxu0 %v944_v43 }
 0x12b   : > { %1798 = vmatprep.subr.mxu1 %v842_v40  ;;  %1831 = vmatprep.subr.mxu0 %v943_v45 }
 0x12c   : > { %1799 = vmatpush3.msra.mxu1 %v842_v40  ;;  %1832 = vmatpush3.msra.mxu0 %v943_v45 }
 0x12d   : > { %1800 = vmatprep.subr.mxu1 %v841_v42  ;;  %1833 = vmatprep.subr.mxu0 %v942_v47 }
 0x12e   : > { %1801 = vmatpush3.msra.mxu1 %v841_v42  ;;  %1834 = vmatpush3.msra.mxu0 %v942_v47 }
 0x12f   : > { %1802 = vmatprep.subr.mxu1 %v840_v44  ;;  %1835 = vmatprep.subr.mxu0 %v941_v56 }
 0x130   : > { %1803 = vmatpush3.msra.mxu1 %v840_v44  ;;  %1836 = vmatpush3.msra.mxu0 %v941_v56 }
 0x131   : > { %1804 = vmatprep.subr.mxu1 %v839_v46  ;;  %1837 = vmatprep.subr.mxu0 %v940_v57 }
 0x132   : > { %1805 = vmatpush3.msra.mxu1 %v839_v46  ;;  %1838 = vmatpush3.msra.mxu0 %v940_v57 }
 0x133   : > { %1806 = vmatprep.subr.mxu1 %v838_v48  ;;  %1839 = vmatprep.subr.mxu0 %v939_v58 }
 0x134   : > { %1807 = vmatpush3.msra.mxu1 %v838_v48  ;;  %1840 = vmatpush3.msra.mxu0 %v939_v58 }
 0x135   : > { %1841 = vmatprep.subr.mxu0 %v938_v59 }
 0x136   : > { %1842 = vmatpush3.msra.mxu0 %v938_v59 }
 0x191   : > { %v830_v50 = vpop.permute.xlu0 %829 }
 0x192   : > { %v832_v52 = vmul.f32 %v830_v50, %v2265_v12  ;;  %v833_v53 = vmul.f32 %v830_v50, %v2262_v10 }
 0x194   : > { %v837_v54 = vadd.f32 %v835_v49, %v833_v53  ;;  %v836_v55 = vadd.f32 %v834_v51, %v832_v52 }
 0x196   : > { %1808 = vmatprep.mubr.f32.mxu1 %v836_v55 }
 0x197   : > { %1809 = vmatmul.mubr.f32.vlgmr.msra.gmra.mxu1 %v837_v54 }
 0x257   : > { %v1810_v61 = vpop.f32.mrf.mxu1 }
 0x258   : > { %v933_v62 = vadd.f32 %v1810_v61, %v1657_v60 }
 0x259   : > { %v927_v63 = vpop.f32.mrf.mxu1 }
 0x25a   : > { %v928_v0 = vadd.f32 %v1657_v60, %v927_v63  ;;  %v937_v2 = vmax.f32 %v933_v62, 0.0 }
 0x25c   : > { %v936_v1 = vmax.f32 %v928_v0, 0.0 }
 0x25e   : > { %1843 = vmatprep.mubr.f32.mxu0 %v936_v1 }
 0x25f   : > { %1844 = vmatmul.mubr.f32.vlgmr.msra.gmra.mxu0 %v937_v2 }
 0x31e   : > { %1040 = sbr.rel (%p1659_p2) target bundleno = 1398 (0x576), region = 103 }
 0x31f   : > { %v1845_v4 = vpop.f32.mrf.mxu0 }
 0x320   : > { %v2318_v5 = vadd.f32 %v1845_v4, %v1658_v3 }
 0x321   : > { %v1027_v6 = vpop.f32.mrf.mxu0 }
 0x322   : > { %v2320_v7 = vadd.f32 %v1658_v3, %v1027_v6 }
 0x323   : > { %v1043_v8 = vld [vmem:[#allocation2 + $0x8] sm:$0xff]  ;;  %v1309_v9 = vmax.f32 %v2318_v5, 0.0  ;;  %v2073_v11 = vmov 0.0   ;;  %v1042_v12 = vld [vmem:[#allocation2] sm:$0xff]  ;;  %vm2074_vm2 = vmmov 0   ;;  %v1134_v13 = vld [vmem:[%s2227_s6 + $0x78] sm:$0xff] }
 0x324   : > { %v1308_v10 = vmax.f32 %v2320_v7, 0.0  ;;  %1846 = vmatprep.subr.mxu0 %v2073_v11  ;;  %1850 = vmatprep.mubr.msk.f32.mxu0 %vm2074_vm2, %v2073_v11  ;;  %v1041_v14 = vld [vmem:[%s2530_s20] sm:$0x3]  ;;  %vm1045_vm3 = vcmask 130048   ;;  %v1133_v15 = vld [vmem:[%s2227_s6 + $0x70] sm:$0xff]  ;;  %v1132_v16 = vld [vmem:[%s2227_s6 + $0x68] sm:$0xff] }
 0x325   : > { %1847 = vmatpush3.msra.mxu0 %v1043_v8  ;;  %1311 = vst [vmem:[#allocation2 + $0x8] sm:$0xff] %v1309_v9  ;;  %1853 = vmatprep.subr.mxu1 %v2073_v11  ;;  %v1131_v17 = vld [vmem:[%s2227_s6 + $0x60] sm:$0xff]  ;;  %v1130_v18 = vld [vmem:[%s2227_s6 + $0x58] sm:$0xff]  ;;  %v1129_v19 = vld [vmem:[%s2227_s6 + $0x50] sm:$0xff] }
 0x326   : > { %1310 = vst [vmem:[#allocation2] sm:$0xff] %v1308_v10  ;;  %1848 = vmatprep.subr.mxu0 %v2073_v11  ;;  %1854 = vmatpush3.msra.mxu1 %v1134_v13  ;;  %v1128_v20 = vld [vmem:[%s2227_s6 + $0x48] sm:$0xff]  ;;  %v1127_v21 = vld [vmem:[%s2227_s6 + $0x40] sm:$0xff]  ;;  %v1126_v22 = vld [vmem:[%s2227_s6 + $0x38] sm:$0xff] }
 0x327   : > { %1849 = vmatpush3.msra.mxu0 %v1042_v12  ;;  %1855 = vmatprep.subr.mxu1 %v2073_v11  ;;  %v1125_v23 = vld [vmem:[%s2227_s6 + $0x30] sm:$0xff]  ;;  %v1124_v24 = vld [vmem:[%s2227_s6 + $0x28] sm:$0xff]  ;;  %v1123_v25 = vld [vmem:[%s2227_s6 + $0x20] sm:$0xff] }
 0x328   : > { %1851 = vmatmul.mubr.msk.f32.vlgmr.msra.gmra.mxu0 %vm1045_vm3, %v1041_v14  ;;  %1856 = vmatpush3.msra.mxu1 %v1133_v15  ;;  %v1122_v26 = vld [vmem:[%s2227_s6 + $0x18] sm:$0xff]  ;;  %v1121_v27 = vld [vmem:[%s2227_s6 + $0x10] sm:$0xff]  ;;  %v1120_v28 = vld [vmem:[%s2227_s6 + $0x8] sm:$0xff] }
 0x329   : > { %1857 = vmatprep.subr.mxu1 %v2073_v11  ;;  %1885 = vmatprep.mubr.msk.f32.mxu1 %vm2074_vm2, %v2073_v11  ;;  %v1119_v29 = vld [vmem:[%s2227_s6] sm:$0xff]  ;;  %v1228_v30 = vld [vmem:[%s2236_s3 + $0x78] sm:$0xff]  ;;  %v1227_v31 = vld [vmem:[%s2236_s3 + $0x70] sm:$0xff] }
 0x32a   : > { %1858 = vmatpush3.msra.mxu1 %v1132_v16  ;;  %1888 = vmatprep.subr.mxu0 %v2073_v11  ;;  %v1226_v32 = vld [vmem:[%s2236_s3 + $0x68] sm:$0xff]  ;;  %v1225_v33 = vld [vmem:[%s2236_s3 + $0x60] sm:$0xff]  ;;  %v1224_v34 = vld [vmem:[%s2236_s3 + $0x58] sm:$0xff] }
 0x32b   : > { %1859 = vmatprep.subr.mxu1 %v2073_v11  ;;  %1920 = vmatprep.mubr.msk.f32.mxu0 %vm2074_vm2, %v2073_v11  ;;  %v1223_v35 = vld [vmem:[%s2236_s3 + $0x50] sm:$0xff]  ;;  %v1222_v36 = vld [vmem:[%s2236_s3 + $0x48] sm:$0xff]  ;;  %v1221_v37 = vld [vmem:[%s2236_s3 + $0x40] sm:$0xff] }
 0x32c   : > { %1860 = vmatpush3.msra.mxu1 %v1131_v17  ;;  %1889 = vmatpush3.msra.mxu0 %v1228_v30  ;;  %v1220_v38 = vld [vmem:[%s2236_s3 + $0x38] sm:$0xff]  ;;  %v1219_v39 = vld [vmem:[%s2236_s3 + $0x30] sm:$0xff]  ;;  %v1218_v40 = vld [vmem:[%s2236_s3 + $0x28] sm:$0xff] }
 0x32d   : > { %1861 = vmatprep.subr.mxu1 %v2073_v11  ;;  %1890 = vmatprep.subr.mxu0 %v2073_v11  ;;  %v1217_v41 = vld [vmem:[%s2236_s3 + $0x20] sm:$0xff]  ;;  %v1216_v42 = vld [vmem:[%s2236_s3 + $0x18] sm:$0xff]  ;;  %v1044_v43 = vld [vmem:[#allocation3] sm:$0x3] }
 0x32e   : > { %1862 = vmatpush3.msra.mxu1 %v1130_v18  ;;  %1891 = vmatpush3.msra.mxu0 %v1227_v31  ;;  %v1215_v47 = vld [vmem:[%s2236_s3 + $0x10] sm:$0xff]  ;;  %v1214_v48 = vld [vmem:[%s2236_s3 + $0x8] sm:$0xff]  ;;  %v1213_v49 = vld [vmem:[%s2236_s3] sm:$0xff] }
 0x32f   : > { %1863 = vmatprep.subr.mxu1 %v2073_v11  ;;  %1892 = vmatprep.subr.mxu0 %v2073_v11  ;;  %v1661_v50 = vld [vmem:[%s2531_s2] ss:$0 sm:$0xff] }
 0x330   : > { %1864 = vmatpush3.msra.mxu1 %v1129_v19  ;;  %1893 = vmatpush3.msra.mxu0 %v1226_v32  ;;  %v1662_v55 = vld [vmem:[%s693_s9] ss:$0 sm:$0xff] }
 0x331   : > { %1865 = vmatprep.subr.mxu1 %v2073_v11  ;;  %1894 = vmatprep.subr.mxu0 %v2073_v11 }
 0x332   : > { %1866 = vmatpush3.msra.mxu1 %v1128_v20  ;;  %1895 = vmatpush3.msra.mxu0 %v1225_v33 }
 0x333   : > { %1867 = vmatprep.subr.mxu1 %v2073_v11  ;;  %1896 = vmatprep.subr.mxu0 %v2073_v11 }
 0x334   : > { %1868 = vmatpush3.msra.mxu1 %v1127_v21  ;;  %1897 = vmatpush3.msra.mxu0 %v1224_v34 }
 0x335   : > { %1869 = vmatprep.subr.mxu1 %v2073_v11  ;;  %1898 = vmatprep.subr.mxu0 %v2073_v11 }
 0x336   : > { %1870 = vmatpush3.msra.mxu1 %v1126_v22  ;;  %1899 = vmatpush3.msra.mxu0 %v1223_v35 }
 0x337   : > { %1871 = vmatprep.subr.mxu1 %v2073_v11  ;;  %1900 = vmatprep.subr.mxu0 %v2073_v11 }
 0x338   : > { %1872 = vmatpush3.msra.mxu1 %v1125_v23  ;;  %1901 = vmatpush3.msra.mxu0 %v1222_v36 }
 0x339   : > { %1873 = vmatprep.subr.mxu1 %v2073_v11  ;;  %1902 = vmatprep.subr.mxu0 %v2073_v11 }
 0x33a   : > { %1874 = vmatpush3.msra.mxu1 %v1124_v24  ;;  %1903 = vmatpush3.msra.mxu0 %v1221_v37 }
 0x33b   : > { %1875 = vmatprep.subr.mxu1 %v2073_v11  ;;  %1904 = vmatprep.subr.mxu0 %v2073_v11 }
 0x33c   : > { %1876 = vmatpush3.msra.mxu1 %v1123_v25  ;;  %1905 = vmatpush3.msra.mxu0 %v1220_v38 }
 0x33d   : > { %1877 = vmatprep.subr.mxu1 %v2073_v11  ;;  %1906 = vmatprep.subr.mxu0 %v2073_v11 }
 0x33e   : > { %1878 = vmatpush3.msra.mxu1 %v1122_v26  ;;  %1907 = vmatpush3.msra.mxu0 %v1219_v39 }
 0x33f   : > { %1879 = vmatprep.subr.mxu1 %v2073_v11  ;;  %1908 = vmatprep.subr.mxu0 %v2073_v11 }
 0x340   : > { %1880 = vmatpush3.msra.mxu1 %v1121_v27  ;;  %1909 = vmatpush3.msra.mxu0 %v1218_v40 }
 0x341   : > { %1881 = vmatprep.subr.mxu1 %v2073_v11  ;;  %1910 = vmatprep.subr.mxu0 %v2073_v11 }
 0x342   : > { %1882 = vmatpush3.msra.mxu1 %v1120_v28  ;;  %1911 = vmatpush3.msra.mxu0 %v1217_v41 }
 0x343   : > { %1883 = vmatprep.subr.mxu1 %v2073_v11  ;;  %1912 = vmatprep.subr.mxu0 %v2073_v11 }
 0x344   : > { %1884 = vmatpush3.msra.mxu1 %v1119_v29  ;;  %1913 = vmatpush3.msra.mxu0 %v1216_v42 }
 0x345   : > { %1914 = vmatprep.subr.mxu0 %v2073_v11 }
 0x346   : > { %1915 = vmatpush3.msra.mxu0 %v1215_v47 }
 0x347   : > { %1916 = vmatprep.subr.mxu0 %v2073_v11 }
 0x348   : > { %1917 = vmatpush3.msra.mxu0 %v1214_v48 }
 0x349   : > { %1918 = vmatprep.subr.mxu0 %v2073_v11 }
 0x34a   : > { %1919 = vmatpush3.msra.mxu0 %v1213_v49 }
 0x3e8   : > { %v1115_v44 = vpop.f32.mrf.mxu0 }
 0x3e9   : > { %v1116_v45 = vadd.f32 %v1115_v44, %v1044_v43 }
 0x3ea   : > { %v1852_v46 = vpop.f32.mrf.mxu0 }
 0x3eb   : > { %1886 = vmatmul.mubr.f32.vlgmr.msra.gmra.mxu1 %v1116_v45 }
 0x4ab   : > { %v1208_v51 = vpop.f32.mrf.mxu1 }
 0x4ac   : > { %v1209_v52 = vadd.f32 %v1661_v50, %v1208_v51 }
 0x4ad   : > { %v1887_v53 = vpop.f32.mrf.mxu1 }
 0x4ae   : > { %v1212_v54 = vmax.f32 %v1209_v52, 0.0 }
 0x4b0   : > { %1921 = vmatmul.mubr.f32.vlgmr.msra.gmra.mxu0 %v1212_v54 }
 0x570   : > { %v1302_v56 = vpop.f32.mrf.mxu0 }
 0x571   : > { %v1303_v57 = vadd.f32 %v1662_v55, %v1302_v56 }
 0x572   : > { %v1922_v58 = vpop.f32.mrf.mxu0 }
 0x573   : > { %v1306_v59 = vmax.f32 %v1303_v57, 0.0 }
 0x575   : > { %1307 = vst [vmem:[#allocation3] sm:$0x3] %v1306_v59 }
 0x576 PF: > { %p1663_p3 = scmp.ne.s32.totalorder %s2191_s5, 4 }
 0x577   : > { %s2532_s0 = sld [smem:[#allocation16_spill]] (!%p1663_p3) }
 0x578   : > { %1314 = sbr.rel (%p1663_p3) target bundleno = 1801 (0x709), region = 107 }
 0x57d   : > { %v2075_v60 = vmov 0.0   ;;  %vm2076_vm4 = vmmov 0   ;;  %v1390_v61 = vld [vmem:[%s2503_s16] sm:$0x3]  ;;  %vm1316_vm5 = vcmask 130048   ;;  %v2077_v63 = vmov 0  }
 0x57e   : > { %1923 = vmatprep.subr.mxu0 %v2075_v60  ;;  %1927 = vmatprep.mubr.msk.f32.mxu0 %vm2076_vm4, %v2075_v60  ;;  %v1315_v62 = vld [vmem:[%s2532_s0] sm:$0x3]  ;;  %v1412_v0 = vld [vmem:[%s2504_s17 + $0x78] sm:$0xff]  ;;  %v1411_v1 = vld [vmem:[%s2504_s17 + $0x70] sm:$0xff] }
 0x57f   : > { %1924 = vmatpush3.msra.mxu0 %v2318_v5  ;;  %1998 = vset.pattern.permute.xlu0 %v2077_v63  ;;  %v1410_v2 = vld [vmem:[%s2504_s17 + $0x68] sm:$0xff]  ;;  %v1409_v3 = vld [vmem:[%s2504_s17 + $0x60] sm:$0xff]  ;;  %v1408_v4 = vld [vmem:[%s2504_s17 + $0x58] sm:$0xff] }
 0x580   : > { %1925 = vmatprep.subr.mxu0 %v2075_v60  ;;  %1393 = vperm.xlu0 %1998, %v1390_v61   ;;  %v1407_v5 = vld [vmem:[%s2504_s17 + $0x50] sm:$0xff]  ;;  %v1406_v6 = vld [vmem:[%s2504_s17 + $0x48] sm:$0xff]  ;;  %v1404_v8 = vld [vmem:[%s2504_s17 + $0x38] sm:$0xff] }
 0x581   : > { %1926 = vmatpush3.msra.mxu0 %v2320_v7  ;;  %1930 = vmatprep.subr.mxu1 %v2075_v60  ;;  %v1405_v7 = vld [vmem:[%s2504_s17 + $0x40] sm:$0xff]  ;;  %v1403_v9 = vld [vmem:[%s2504_s17 + $0x30] sm:$0xff]  ;;  %v1402_v10 = vld [vmem:[%s2504_s17 + $0x28] sm:$0xff] }
 0x582   : > { %1928 = vmatmul.mubr.msk.f32.vlgmr.msra.gmra.mxu0 %vm1316_vm5, %v1315_v62  ;;  %1931 = vmatpush3.msra.mxu1 %v1412_v0  ;;  %v1401_v11 = vld [vmem:[%s2504_s17 + $0x20] sm:$0xff]  ;;  %v1400_v12 = vld [vmem:[%s2504_s17 + $0x18] sm:$0xff]  ;;  %v1399_v13 = vld [vmem:[%s2504_s17 + $0x10] sm:$0xff] }
 0x583   : > { %1932 = vmatprep.subr.mxu1 %v2075_v60  ;;  %1962 = vmatprep.mubr.msk.f32.mxu1 %vm2076_vm4, %v2075_v60  ;;  %v1398_v14 = vld [vmem:[%s2504_s17 + $0x8] sm:$0xff]  ;;  %v1397_v15 = vld [vmem:[%s2504_s17] sm:$0xff] }
 0x584   : > { %1933 = vmatpush3.msra.mxu1 %v1411_v1  ;;  %v1665_v20 = vld [vmem:[%s2505_s18] ss:$0 sm:$0xff] }
 0x585   : > { %1934 = vmatprep.subr.mxu1 %v2075_v60 }
 0x586   : > { %1935 = vmatpush3.msra.mxu1 %v1410_v2 }
 0x587   : > { %1936 = vmatprep.subr.mxu1 %v2075_v60 }
 0x588   : > { %1937 = vmatpush3.msra.mxu1 %v1409_v3 }
 0x589   : > { %1938 = vmatprep.subr.mxu1 %v2075_v60 }
 0x58a   : > { %1939 = vmatpush3.msra.mxu1 %v1408_v4 }
 0x58b   : > { %1940 = vmatprep.subr.mxu1 %v2075_v60 }
 0x58c   : > { %1941 = vmatpush3.msra.mxu1 %v1407_v5 }
 0x58d   : > { %1942 = vmatprep.subr.mxu1 %v2075_v60 }
 0x58e   : > { %1943 = vmatpush3.msra.mxu1 %v1406_v6 }
 0x58f   : > { %1944 = vmatprep.subr.mxu1 %v2075_v60 }
 0x590   : > { %1945 = vmatpush3.msra.mxu1 %v1405_v7 }
 0x591   : > { %1946 = vmatprep.subr.mxu1 %v2075_v60 }
 0x592   : > { %1947 = vmatpush3.msra.mxu1 %v1404_v8 }
 0x593   : > { %1948 = vmatprep.subr.mxu1 %v2075_v60 }
 0x594   : > { %1949 = vmatpush3.msra.mxu1 %v1403_v9 }
 0x595   : > { %1950 = vmatprep.subr.mxu1 %v2075_v60 }
 0x596   : > { %1951 = vmatpush3.msra.mxu1 %v1402_v10 }
 0x597   : > { %1952 = vmatprep.subr.mxu1 %v2075_v60 }
 0x598   : > { %1953 = vmatpush3.msra.mxu1 %v1401_v11 }
 0x599   : > { %1954 = vmatprep.subr.mxu1 %v2075_v60 }
 0x59a   : > { %1955 = vmatpush3.msra.mxu1 %v1400_v12 }
 0x59b   : > { %1956 = vmatprep.subr.mxu1 %v2075_v60 }
 0x59c   : > { %1957 = vmatpush3.msra.mxu1 %v1399_v13 }
 0x59d   : > { %1958 = vmatprep.subr.mxu1 %v2075_v60 }
 0x59e   : > { %1959 = vmatpush3.msra.mxu1 %v1398_v14 }
 0x59f   : > { %1960 = vmatprep.subr.mxu1 %v2075_v60 }
 0x5a0   : > { %1961 = vmatpush3.msra.mxu1 %v1397_v15 }
 0x5fb   : > { %v1394_v16 = vpop.permute.xlu0 %1393 }
 0x642   : > { %v1386_v17 = vpop.f32.mrf.mxu0 }
 0x643   : > { %v1396_v18 = vmul.f32 %v1394_v16, %v1386_v17 }
 0x644   : > { %v1929_v19 = vpop.f32.mrf.mxu0 }
 0x645   : > { %1963 = vmatmul.mubr.f32.vlgmr.msra.gmra.mxu1 %v1396_v18 }
 0x705   : > { %v1486_v21 = vpop.f32.mrf.mxu1 }
 0x706   : > { %v1487_v22 = vadd.f32 %v1665_v20, %v1486_v21 }
 0x707   : > { %v1964_v23 = vpop.f32.mrf.mxu1 }
 0x708   : > { %1490 = vst [vmem:[#allocation8] sm:$0x3] %v1487_v22 }
 0x709 PF: > { %s2078_s4 = smov [#allocation8]  }
 0x70a   : > { %s1498_s0 = sshll.u32 %s2078_s4, 4  ;;  %s1499_s0 = int_to_ptr.vmem [resolvable:$true] %s1498_s0 }
 0x70b   : > { %s2023_s21 = scalar_lea.vmem %s1499_s0, 32  ;;  %p2030_p7 = scmp.lt.s32.totalorder %s1499_s0, %s1499_s0 }
 0x70c   : > { %p2024_p4 = scmp.ne.s32.totalorder %s1499_s0, %s2023_s21  ;;  %p2031_p8 = scmp.lt.s32.totalorder %s2023_s21, %s2023_s21 }
 0x70e   : > { %p2025_p5 = pnand %p2024_p4, %p1659_p2  ;;  %p2032_p9 = por %p2031_p8, %p2030_p7 }
 0x710   : > { %p2026_p6 = pneg %p2025_p5 }
 0x712   : > { %p2033_p10 = pnand %p2032_p9, %p2026_p6 }
 0x714   : > { %2036 = shalt.err (!%p2033_p10)
}
 0x715   : > { %s2533_s26 = sld [smem:[#allocation21_spill]] }
 0x71b   : > { %1966 = dma.vmem_to_hbm [thread:$0]  (%p1659_p2), %s1499_s0, 32, %s2533_s26, [#allocation9]  }
 0x71c   : > { %2058 = dma.done.wait (%p1659_p2), [#allocation9], 32  }
 0x71d   : > { %2060 = vsyncadd (%p1659_p2), [#allocation9], 4294967264 }
 0x71e PF: > { %s2534_s25 = sld [smem:[#allocation12_spill]] }
 0x724   : > { %s40_s1 = sadd.s32 1, %s2534_s25  }
 0x725   : > { %p37_p11 = scmp.ge.s32.totalorder %s40_s1, 7  }
 0x727   :  { %39 = sbr.rel (!%p37_p11) target bundleno = 41 (0x29), region = 175 }
 0x72c   :  { %1511 = vsyncpa [#allocation9], 1 }
 0x72d   :  { %1513 = vsyncpa [#allocation9 + $0x1], 1 }

</bundles_post_ra>
